<compile_context>
chip_gen: v7x
topology: tpu7x:2x2x1
jax: 0.10.0
libtpu: 0.0.40
codegen_flags: <defaults>
</compile_context>

<pallas_src>
import functools
import math

import jax
import jax.numpy as jnp
from jax import lax
from jax.experimental import pallas as pl
from jax.experimental.pallas import tpu as pltpu


# ----------------------------------------------------------------- kernel ----
def _mha_kernel(n_heads, d_k, d_v, has_mask, has_dropout, *refs):
    idx = 0
    q_ref = refs[idx]; idx += 1
    k_ref = refs[idx]; idx += 1
    v_ref = refs[idx]; idx += 1
    mask_ref = None
    drop_ref = None
    if has_mask:
        mask_ref = refs[idx]; idx += 1
    if has_dropout:
        drop_ref = refs[idx]; idx += 1
    wq_ref, wk_ref, wv_ref, wo_ref, out_ref, attn_ref = refs[idx:]

    # One batch row per grid step: [S, d_model], computed in f32.
    q = q_ref[0].astype(jnp.float32)
    k = k_ref[0].astype(jnp.float32)
    v = v_ref[0].astype(jnp.float32)

    # Fused input projections on the MXU (bias-free Linear layers).
    pq = jnp.dot(q, wq_ref[...].astype(jnp.float32), preferred_element_type=jnp.float32)
    pk = jnp.dot(k, wk_ref[...].astype(jnp.float32), preferred_element_type=jnp.float32)
    pv = jnp.dot(v, wv_ref[...].astype(jnp.float32), preferred_element_type=jnp.float32)

    inv_sqrt_dk = 1.0 / math.sqrt(d_k)

    ctx_heads = []
    for h in range(n_heads):  # small static head loop; only 2-D ops in the body
        qh = pq[:, h * d_k:(h + 1) * d_k]          # [S_q, d_k]
        kh = pk[:, h * d_k:(h + 1) * d_k]          # [S_k, d_k]
        vh = pv[:, h * d_v:(h + 1) * d_v]          # [S_k, d_v]

        # scores = Q @ K^T / sqrt(d_k)  (contract on d_k, no transpose copy)
        scores = lax.dot_general(qh, kh, (((1,), (1,)), ((), ())),
                                 preferred_element_type=jnp.float32) * inv_sqrt_dk
        if mask_ref is not None:
            scores = jnp.where(mask_ref[0] == 0, -1e9, scores)

        # numerically-stable softmax over keys
        m = jnp.max(scores, axis=-1, keepdims=True)
        e = jnp.exp(scores - m)
        attn = e / jnp.sum(e, axis=-1, keepdims=True)

        if drop_ref is not None:
            # Pre-scaled keep mask (keep / (1 - p)) -> nn.Dropout train semantics.
            attn = attn * drop_ref[0, h]

        attn_ref[0, h] = attn.astype(attn_ref.dtype)   # post-dropout, like the torch module
        ctx_heads.append(jnp.dot(attn, vh, preferred_element_type=jnp.float32))  # [S_q, d_v]

    ctx = jnp.concatenate(ctx_heads, axis=-1)                 # [S_q, n_heads * d_v]
    out = jnp.dot(ctx, wo_ref[...].astype(jnp.float32),
                  preferred_element_type=jnp.float32)         # [S_q, d_model]
    out_ref[0] = out.astype(out_ref.dtype)


# ---------------------------------------------------------------- wrapper ----
def multi_head_attention(key, query, value, w_q, w_k, w_v, w_o, *,
                         n_heads, d_k, d_v, mask=None,
                         dropout_rate=0.0, dropout_key=None, training=False):
    """Forward pass of MultiHeadAttention.

    key/query/value: [B, S, d_model]
    w_q/w_k: [d_model, n_heads*d_k], w_v: [d_model, n_heads*d_v], w_o: [n_heads*d_v, d_model]
      (i.e. the transpose of torch's nn.Linear.weight, so x @ w == nn.Linear(x)).
    mask: optional [B, S_q, S_k]; positions with mask == 0 get -1e9 before softmax.
    Returns (attn_out [B, S_q, d_model], attn_weights [B, n_heads, S_q, S_k]).
    """
    B, S_q, d_model = query.shape
    S_k = key.shape[1]
    assert key.shape[0] == B and value.shape[0] == B and value.shape[1] == S_k

    has_mask = mask is not None
    has_dropout = training and dropout_rate > 0.0

    inputs = [query, key, value]
    in_specs = [
        pl.BlockSpec((1, S_q, d_model), lambda b: (b, 0, 0)),
        pl.BlockSpec((1, S_k, d_model), lambda b: (b, 0, 0)),
        pl.BlockSpec((1, S_k, d_model), lambda b: (b, 0, 0)),
    ]
    if has_mask:
        inputs.append(mask.astype(jnp.int32))
        in_specs.append(pl.BlockSpec((1, S_q, S_k), lambda b: (b, 0, 0)))
    if has_dropout:
        if dropout_key is None:
            dropout_key = jax.random.PRNGKey(0)
        keep = jax.random.bernoulli(dropout_key, 1.0 - dropout_rate,
                                    (B, n_heads, S_q, S_k))
        inputs.append(keep.astype(jnp.float32) / (1.0 - dropout_rate))
        in_specs.append(pl.BlockSpec((1, n_heads, S_q, S_k), lambda b: (b, 0, 0, 0)))

    inputs += [w_q, w_k, w_v, w_o]
    in_specs += [
        pl.BlockSpec(w_q.shape, lambda b: (0, 0)),
        pl.BlockSpec(w_k.shape, lambda b: (0, 0)),
        pl.BlockSpec(w_v.shape, lambda b: (0, 0)),
        pl.BlockSpec(w_o.shape, lambda b: (0, 0)),
    ]

    out_shape = (
        jax.ShapeDtypeStruct((B, S_q, d_model), query.dtype),
        jax.ShapeDtypeStruct((B, n_heads, S_q, S_k), jnp.float32),
    )
    out_specs = (
        pl.BlockSpec((1, S_q, d_model), lambda b: (b, 0, 0)),
        pl.BlockSpec((1, n_heads, S_q, S_k), lambda b: (b, 0, 0, 0)),
    )

    kernel = functools.partial(_mha_kernel, n_heads, d_k, d_v, has_mask, has_dropout)
    return pl.pallas_call(
        kernel,
        grid=(B,),
        in_specs=in_specs,
        out_specs=out_specs,
        out_shape=out_shape,
        compiler_params=pltpu.CompilerParams(
            dimension_semantics=("parallel",),      # shard batch rows across TCs (v7x)
            vmem_limit_bytes=32 * 1024 * 1024,      # safe on v5e/v6e/v7x
        ),
    )(*inputs)


# ---------------------------------------------------------- pure-JAX ref -----
def _reference_mha(key, query, value, w_q, w_k, w_v, w_o, n_heads, d_k, d_v, mask):
    B, S_q, _ = query.shape
    S_k = key.shape[1]
    pq = (query @ w_q).reshape(B, S_q, n_heads, d_k).transpose(0, 2, 1, 3)
    pk = (key @ w_k).reshape(B, S_k, n_heads, d_k).transpose(0, 2, 1, 3)
    pv = (value @ w_v).reshape(B, S_k, n_heads, d_v).transpose(0, 2, 1, 3)
    scores = jnp.einsum('bhqd,bhkd->bhqk', pq, pk) / math.sqrt(d_k)
    if mask is not None:
        scores = jnp.where(mask[:, None, :, :] == 0, -1e9, scores)
    w = jax.nn.softmax(scores, axis=-1)
    ctx = jnp.einsum('bhqk,bhkd->bhqd', w, pv)
    ctx = ctx.transpose(0, 2, 1, 3).reshape(B, S_q, n_heads * d_v)
    return ctx @ w_o, w


if __name__ == "__main__":
    root = jax.random.PRNGKey(0)
    k_key, k_query, k_value, k_wq, k_wk, k_wv, k_wo = jax.random.split(root, 7)

    batch, seq, d_model = 2, 8, 32
    n_heads, d_k, d_v = 4, 8, 8
    dropout = 0.1  # applied only in training mode; eval forward (below) is identity

    key_in = jax.random.normal(k_key, (batch, seq, d_model), jnp.float32)
    query_in = jax.random.normal(k_query, (batch, seq, d_model), jnp.float32)
    value_in = jax.random.normal(k_value, (batch, seq, d_model), jnp.float32)

    wscale = 1.0 / math.sqrt(d_model)
    w_q = jax.random.normal(k_wq, (d_model, n_heads * d_k), jnp.float32) * wscale
    w_k = jax.random.normal(k_wk, (d_model, n_heads * d_k), jnp.float32) * wscale
    w_v = jax.random.normal(k_wv, (d_model, n_heads * d_v), jnp.float32) * wscale
    w_o = jax.random.normal(k_wo, (n_heads * d_v, d_model), jnp.float32) * wscale

    # Causal-style mask [B, S_q, S_k]; mask == 0 positions are blocked (filled with -1e9).
    mask = jnp.broadcast_to(jnp.tril(jnp.ones((seq, seq), jnp.int32)), (batch, seq, seq))

    out, attn_w = multi_head_attention(
        key_in, query_in, value_in, w_q, w_k, w_v, w_o,
        n_heads=n_heads, d_k=d_k, d_v=d_v, mask=mask,
        dropout_rate=dropout, training=False)
    jax.block_until_ready((out, attn_w))

    ref_out, ref_w = _reference_mha(key_in, query_in, value_in, w_q, w_k, w_v, w_o,
                                    n_heads, d_k, d_v, mask)
    assert out.shape == (batch, seq, d_model)
    assert attn_w.shape == (batch, n_heads, seq, seq)
    assert jnp.allclose(out, ref_out, atol=1e-4, rtol=1e-4)
    assert jnp.allclose(attn_w, ref_w, atol=1e-4, rtol=1e-4)
    print("KERNEL_OK")
</pallas_src>

<mosaic_0001>
module attributes {stable_mosaic.version = 11 : i64} {
  func.func @_mha_kernel(%arg0: i32, %arg1: memref<1x8x32xf32, #tpu.memory_space<vmem>>, %arg2: memref<1x8x32xf32, #tpu.memory_space<vmem>>, %arg3: memref<1x8x32xf32, #tpu.memory_space<vmem>>, %arg4: memref<1x8x8xi32, #tpu.memory_space<vmem>>, %arg5: memref<32x32xf32, #tpu.memory_space<vmem>>, %arg6: memref<32x32xf32, #tpu.memory_space<vmem>>, %arg7: memref<32x32xf32, #tpu.memory_space<vmem>>, %arg8: memref<32x32xf32, #tpu.memory_space<vmem>>, %arg9: memref<1x8x32xf32, #tpu.memory_space<vmem>>, %arg10: memref<1x4x8x8xf32, #tpu.memory_space<vmem>>) attributes {dimension_semantics = [#tpu.dimension_semantics<parallel>], iteration_bounds = array<i64: 2>, scalar_prefetch = 0 : i64, scratch_operands = 0 : i64, tpu.core_type = #tpu.core_type<tc>, window_params = [{transform_indices = @transform_0, window_bounds = array<i64: 1, 8, 32>}, {transform_indices = @transform_1, window_bounds = array<i64: 1, 8, 32>}, {transform_indices = @transform_2, window_bounds = array<i64: 1, 8, 32>}, {transform_indices = @transform_3, window_bounds = array<i64: 1, 8, 8>}, {pipeline_mode = #tpu.pipeline_mode<synchronous>, transform_indices = @transform_4, window_bounds = array<i64: 32, 32>}, {pipeline_mode = #tpu.pipeline_mode<synchronous>, transform_indices = @transform_5, window_bounds = array<i64: 32, 32>}, {pipeline_mode = #tpu.pipeline_mode<synchronous>, transform_indices = @transform_6, window_bounds = array<i64: 32, 32>}, {pipeline_mode = #tpu.pipeline_mode<synchronous>, transform_indices = @transform_7, window_bounds = array<i64: 32, 32>}, {transform_indices = @transform_8, window_bounds = array<i64: 1, 8, 32>}, {transform_indices = @transform_9, window_bounds = array<i64: 1, 4, 8, 8>}]} {
    %c0 = arith.constant 0 : index
    %c0_0 = arith.constant 0 : index
    %c0_1 = arith.constant 0 : index
    %0 = vector.load %arg1[%c0, %c0_0, %c0_1] : memref<1x8x32xf32, #tpu.memory_space<vmem>>, vector<1x8x32xf32>
    %1 = vector.shape_cast %0 : vector<1x8x32xf32> to vector<8x32xf32>
    %c0_2 = arith.constant 0 : index
    %c0_3 = arith.constant 0 : index
    %c0_4 = arith.constant 0 : index
    %2 = vector.load %arg2[%c0_2, %c0_3, %c0_4] : memref<1x8x32xf32, #tpu.memory_space<vmem>>, vector<1x8x32xf32>
    %3 = vector.shape_cast %2 : vector<1x8x32xf32> to vector<8x32xf32>
    %c0_5 = arith.constant 0 : index
    %c0_6 = arith.constant 0 : index
    %c0_7 = arith.constant 0 : index
    %4 = vector.load %arg3[%c0_5, %c0_6, %c0_7] : memref<1x8x32xf32, #tpu.memory_space<vmem>>, vector<1x8x32xf32>
    %5 = vector.shape_cast %4 : vector<1x8x32xf32> to vector<8x32xf32>
    %c0_8 = arith.constant 0 : index
    %c0_9 = arith.constant 0 : index
    %6 = vector.load %arg5[%c0_8, %c0_9] : memref<32x32xf32, #tpu.memory_space<vmem>>, vector<32x32xf32>
    %cst = arith.constant dense<0.000000e+00> : vector<8x32xf32>
    %7 = tpu.matmul %1, %6, %cst {dimension_numbers = #tpu.dot_dimension_numbers<[1], [0], [0], [1], [0, 0, 1, 1], [], []>} : vector<8x32xf32>, vector<32x32xf32>, vector<8x32xf32> -> vector<8x32xf32>
    %c0_10 = arith.constant 0 : index
    %c0_11 = arith.constant 0 : index
    %8 = vector.load %arg6[%c0_10, %c0_11] : memref<32x32xf32, #tpu.memory_space<vmem>>, vector<32x32xf32>
    %cst_12 = arith.constant dense<0.000000e+00> : vector<8x32xf32>
    %9 = tpu.matmul %3, %8, %cst_12 {dimension_numbers = #tpu.dot_dimension_numbers<[1], [0], [0], [1], [0, 0, 1, 1], [], []>} : vector<8x32xf32>, vector<32x32xf32>, vector<8x32xf32> -> vector<8x32xf32>
    %c0_13 = arith.constant 0 : index
    %c0_14 = arith.constant 0 : index
    %10 = vector.load %arg7[%c0_13, %c0_14] : memref<32x32xf32, #tpu.memory_space<vmem>>, vector<32x32xf32>
    %cst_15 = arith.constant dense<0.000000e+00> : vector<8x32xf32>
    %11 = tpu.matmul %5, %10, %cst_15 {dimension_numbers = #tpu.dot_dimension_numbers<[1], [0], [0], [1], [0, 0, 1, 1], [], []>} : vector<8x32xf32>, vector<32x32xf32>, vector<8x32xf32> -> vector<8x32xf32>
    %12 = vector.extract_strided_slice %7 {offsets = [0, 0], sizes = [8, 8], strides = [1, 1]} : vector<8x32xf32> to vector<8x8xf32>
    %13 = vector.extract_strided_slice %9 {offsets = [0, 0], sizes = [8, 8], strides = [1, 1]} : vector<8x32xf32> to vector<8x8xf32>
    %14 = vector.extract_strided_slice %11 {offsets = [0, 0], sizes = [8, 8], strides = [1, 1]} : vector<8x32xf32> to vector<8x8xf32>
    %cst_16 = arith.constant dense<0.000000e+00> : vector<8x8xf32>
    %15 = tpu.matmul %12, %13, %cst_16 {dimension_numbers = #tpu.dot_dimension_numbers<[1], [1], [0], [0], [0, 0, 1, 0], [], []>} : vector<8x8xf32>, vector<8x8xf32>, vector<8x8xf32> -> vector<8x8xf32>
    %cst_17 = arith.constant 0.353553385 : f32
    %16 = vector.broadcast %cst_17 : f32 to vector<8x8xf32>
    %17 = arith.mulf %15, %16 : vector<8x8xf32>
    %c0_18 = arith.constant 0 : index
    %c0_19 = arith.constant 0 : index
    %c0_20 = arith.constant 0 : index
    %18 = vector.load %arg4[%c0_18, %c0_19, %c0_20] : memref<1x8x8xi32, #tpu.memory_space<vmem>>, vector<1x8x8xi32>
    %19 = vector.shape_cast %18 : vector<1x8x8xi32> to vector<8x8xi32>
    %c0_i32 = arith.constant 0 : i32
    %20 = vector.broadcast %c0_i32 : i32 to vector<8x8xi32>
    %21 = arith.cmpi eq, %19, %20 : vector<8x8xi32>
    %cst_21 = arith.constant -1.000000e+09 : f32
    %22 = vector.broadcast %cst_21 : f32 to vector<8x8xf32>
    %23 = arith.select %21, %22, %17 : vector<8x8xi1>, vector<8x8xf32>
    %cst_22 = arith.constant dense<0xFF800000> : vector<8xf32>
    %24 = vector.multi_reduction <maximumf>, %23, %cst_22 [1] : vector<8x8xf32> to vector<8xf32>
    %25 = vector.shape_cast %24 : vector<8xf32> to vector<8x1xf32>
    %26 = vector.broadcast %25 : vector<8x1xf32> to vector<8x8xf32>
    %27 = arith.subf %23, %26 : vector<8x8xf32>
    %28 = math.exp %27 : vector<8x8xf32>
    %cst_23 = arith.constant dense<0.000000e+00> : vector<8xf32>
    %29 = vector.multi_reduction <add>, %28, %cst_23 [1] : vector<8x8xf32> to vector<8xf32>
    %30 = vector.shape_cast %29 : vector<8xf32> to vector<8x1xf32>
    %31 = vector.broadcast %30 : vector<8x1xf32> to vector<8x8xf32>
    %32 = arith.divf %28, %31 : vector<8x8xf32>
    %c0_24 = arith.constant 0 : index
    %c0_25 = arith.constant 0 : index
    %c0_26 = arith.constant 0 : index
    %c0_27 = arith.constant 0 : index
    %33 = vector.load %arg10[%c0_24, %c0_25, %c0_26, %c0_27] : memref<1x4x8x8xf32, #tpu.memory_space<vmem>>, vector<1x1x8x8xf32>
    %34 = vector.shape_cast %33 : vector<1x1x8x8xf32> to vector<8x8xf32>
    %35 = vector.shape_cast %32 : vector<8x8xf32> to vector<1x1x8x8xf32>
    tpu.vector_store %arg10[%c0_24, %c0_25, %c0_26, %c0_27], %35 {strides = array<i32>} : memref<1x4x8x8xf32, #tpu.memory_space<vmem>>, vector<1x1x8x8xf32>,
    %cst_28 = arith.constant dense<0.000000e+00> : vector<8x8xf32>
    %36 = tpu.matmul %32, %14, %cst_28 {dimension_numbers = #tpu.dot_dimension_numbers<[1], [0], [0], [1], [0, 0, 1, 1], [], []>} : vector<8x8xf32>, vector<8x8xf32>, vector<8x8xf32> -> vector<8x8xf32>
    %37 = vector.extract_strided_slice %7 {offsets = [0, 8], sizes = [8, 8], strides = [1, 1]} : vector<8x32xf32> to vector<8x8xf32>
    %38 = vector.extract_strided_slice %9 {offsets = [0, 8], sizes = [8, 8], strides = [1, 1]} : vector<8x32xf32> to vector<8x8xf32>
    %39 = vector.extract_strided_slice %11 {offsets = [0, 8], sizes = [8, 8], strides = [1, 1]} : vector<8x32xf32> to vector<8x8xf32>
    %cst_29 = arith.constant dense<0.000000e+00> : vector<8x8xf32>
    %40 = tpu.matmul %37, %38, %cst_29 {dimension_numbers = #tpu.dot_dimension_numbers<[1], [1], [0], [0], [0, 0, 1, 0], [], []>} : vector<8x8xf32>, vector<8x8xf32>, vector<8x8xf32> -> vector<8x8xf32>
    %cst_30 = arith.constant 0.353553385 : f32
    %41 = vector.broadcast %cst_30 : f32 to vector<8x8xf32>
    %42 = arith.mulf %40, %41 : vector<8x8xf32>
    %c0_31 = arith.constant 0 : index
    %c0_32 = arith.constant 0 : index
    %c0_33 = arith.constant 0 : index
    %43 = vector.load %arg4[%c0_31, %c0_32, %c0_33] : memref<1x8x8xi32, #tpu.memory_space<vmem>>, vector<1x8x8xi32>
    %44 = vector.shape_cast %43 : vector<1x8x8xi32> to vector<8x8xi32>
    %c0_i32_34 = arith.constant 0 : i32
    %45 = vector.broadcast %c0_i32_34 : i32 to vector<8x8xi32>
    %46 = arith.cmpi eq, %44, %45 : vector<8x8xi32>
    %cst_35 = arith.constant -1.000000e+09 : f32
    %47 = vector.broadcast %cst_35 : f32 to vector<8x8xf32>
    %48 = arith.select %46, %47, %42 : vector<8x8xi1>, vector<8x8xf32>
    %cst_36 = arith.constant dense<0xFF800000> : vector<8xf32>
    %49 = vector.multi_reduction <maximumf>, %48, %cst_36 [1] : vector<8x8xf32> to vector<8xf32>
    %50 = vector.shape_cast %49 : vector<8xf32> to vector<8x1xf32>
    %51 = vector.broadcast %50 : vector<8x1xf32> to vector<8x8xf32>
    %52 = arith.subf %48, %51 : vector<8x8xf32>
    %53 = math.exp %52 : vector<8x8xf32>
    %cst_37 = arith.constant dense<0.000000e+00> : vector<8xf32>
    %54 = vector.multi_reduction <add>, %53, %cst_37 [1] : vector<8x8xf32> to vector<8xf32>
    %55 = vector.shape_cast %54 : vector<8xf32> to vector<8x1xf32>
    %56 = vector.broadcast %55 : vector<8x1xf32> to vector<8x8xf32>
    %57 = arith.divf %53, %56 : vector<8x8xf32>
    %c0_38 = arith.constant 0 : index
    %c1 = arith.constant 1 : index
    %c0_39 = arith.constant 0 : index
    %c0_40 = arith.constant 0 : index
    %58 = vector.load %arg10[%c0_38, %c1, %c0_39, %c0_40] : memref<1x4x8x8xf32, #tpu.memory_space<vmem>>, vector<1x1x8x8xf32>
    %59 = vector.shape_cast %58 : vector<1x1x8x8xf32> to vector<8x8xf32>
    %60 = vector.shape_cast %57 : vector<8x8xf32> to vector<1x1x8x8xf32>
    tpu.vector_store %arg10[%c0_38, %c1, %c0_39, %c0_40], %60 {strides = array<i32>} : memref<1x4x8x8xf32, #tpu.memory_space<vmem>>, vector<1x1x8x8xf32>,
    %cst_41 = arith.constant dense<0.000000e+00> : vector<8x8xf32>
    %61 = tpu.matmul %57, %39, %cst_41 {dimension_numbers = #tpu.dot_dimension_numbers<[1], [0], [0], [1], [0, 0, 1, 1], [], []>} : vector<8x8xf32>, vector<8x8xf32>, vector<8x8xf32> -> vector<8x8xf32>
    %62 = vector.extract_strided_slice %7 {offsets = [0, 16], sizes = [8, 8], strides = [1, 1]} : vector<8x32xf32> to vector<8x8xf32>
    %63 = vector.extract_strided_slice %9 {offsets = [0, 16], sizes = [8, 8], strides = [1, 1]} : vector<8x32xf32> to vector<8x8xf32>
    %64 = vector.extract_strided_slice %11 {offsets = [0, 16], sizes = [8, 8], strides = [1, 1]} : vector<8x32xf32> to vector<8x8xf32>
    %cst_42 = arith.constant dense<0.000000e+00> : vector<8x8xf32>
    %65 = tpu.matmul %62, %63, %cst_42 {dimension_numbers = #tpu.dot_dimension_numbers<[1], [1], [0], [0], [0, 0, 1, 0], [], []>} : vector<8x8xf32>, vector<8x8xf32>, vector<8x8xf32> -> vector<8x8xf32>
    %cst_43 = arith.constant 0.353553385 : f32
    %66 = vector.broadcast %cst_43 : f32 to vector<8x8xf32>
    %67 = arith.mulf %65, %66 : vector<8x8xf32>
    %c0_44 = arith.constant 0 : index
    %c0_45 = arith.constant 0 : index
    %c0_46 = arith.constant 0 : index
    %68 = vector.load %arg4[%c0_44, %c0_45, %c0_46] : memref<1x8x8xi32, #tpu.memory_space<vmem>>, vector<1x8x8xi32>
    %69 = vector.shape_cast %68 : vector<1x8x8xi32> to vector<8x8xi32>
    %c0_i32_47 = arith.constant 0 : i32
    %70 = vector.broadcast %c0_i32_47 : i32 to vector<8x8xi32>
    %71 = arith.cmpi eq, %69, %70 : vector<8x8xi32>
    %cst_48 = arith.constant -1.000000e+09 : f32
    %72 = vector.broadcast %cst_48 : f32 to vector<8x8xf32>
    %73 = arith.select %71, %72, %67 : vector<8x8xi1>, vector<8x8xf32>
    %cst_49 = arith.constant dense<0xFF800000> : vector<8xf32>
    %74 = vector.multi_reduction <maximumf>, %73, %cst_49 [1] : vector<8x8xf32> to vector<8xf32>
    %75 = vector.shape_cast %74 : vector<8xf32> to vector<8x1xf32>
    %76 = vector.broadcast %75 : vector<8x1xf32> to vector<8x8xf32>
    %77 = arith.subf %73, %76 : vector<8x8xf32>
    %78 = math.exp %77 : vector<8x8xf32>
    %cst_50 = arith.constant dense<0.000000e+00> : vector<8xf32>
    %79 = vector.multi_reduction <add>, %78, %cst_50 [1] : vector<8x8xf32> to vector<8xf32>
    %80 = vector.shape_cast %79 : vector<8xf32> to vector<8x1xf32>
    %81 = vector.broadcast %80 : vector<8x1xf32> to vector<8x8xf32>
    %82 = arith.divf %78, %81 : vector<8x8xf32>
    %c0_51 = arith.constant 0 : index
    %c2 = arith.constant 2 : index
    %c0_52 = arith.constant 0 : index
    %c0_53 = arith.constant 0 : index
    %83 = vector.load %arg10[%c0_51, %c2, %c0_52, %c0_53] : memref<1x4x8x8xf32, #tpu.memory_space<vmem>>, vector<1x1x8x8xf32>
    %84 = vector.shape_cast %83 : vector<1x1x8x8xf32> to vector<8x8xf32>
    %85 = vector.shape_cast %82 : vector<8x8xf32> to vector<1x1x8x8xf32>
    tpu.vector_store %arg10[%c0_51, %c2, %c0_52, %c0_53], %85 {strides = array<i32>} : memref<1x4x8x8xf32, #tpu.memory_space<vmem>>, vector<1x1x8x8xf32>,
    %cst_54 = arith.constant dense<0.000000e+00> : vector<8x8xf32>
    %86 = tpu.matmul %82, %64, %cst_54 {dimension_numbers = #tpu.dot_dimension_numbers<[1], [0], [0], [1], [0, 0, 1, 1], [], []>} : vector<8x8xf32>, vector<8x8xf32>, vector<8x8xf32> -> vector<8x8xf32>
    %87 = vector.extract_strided_slice %7 {offsets = [0, 24], sizes = [8, 8], strides = [1, 1]} : vector<8x32xf32> to vector<8x8xf32>
    %88 = vector.extract_strided_slice %9 {offsets = [0, 24], sizes = [8, 8], strides = [1, 1]} : vector<8x32xf32> to vector<8x8xf32>
    %89 = vector.extract_strided_slice %11 {offsets = [0, 24], sizes = [8, 8], strides = [1, 1]} : vector<8x32xf32> to vector<8x8xf32>
    %cst_55 = arith.constant dense<0.000000e+00> : vector<8x8xf32>
    %90 = tpu.matmul %87, %88, %cst_55 {dimension_numbers = #tpu.dot_dimension_numbers<[1], [1], [0], [0], [0, 0, 1, 0], [], []>} : vector<8x8xf32>, vector<8x8xf32>, vector<8x8xf32> -> vector<8x8xf32>
    %cst_56 = arith.constant 0.353553385 : f32
    %91 = vector.broadcast %cst_56 : f32 to vector<8x8xf32>
    %92 = arith.mulf %90, %91 : vector<8x8xf32>
    %c0_57 = arith.constant 0 : index
    %c0_58 = arith.constant 0 : index
    %c0_59 = arith.constant 0 : index
    %93 = vector.load %arg4[%c0_57, %c0_58, %c0_59] : memref<1x8x8xi32, #tpu.memory_space<vmem>>, vector<1x8x8xi32>
    %94 = vector.shape_cast %93 : vector<1x8x8xi32> to vector<8x8xi32>
    %c0_i32_60 = arith.constant 0 : i32
    %95 = vector.broadcast %c0_i32_60 : i32 to vector<8x8xi32>
    %96 = arith.cmpi eq, %94, %95 : vector<8x8xi32>
    %cst_61 = arith.constant -1.000000e+09 : f32
    %97 = vector.broadcast %cst_61 : f32 to vector<8x8xf32>
    %98 = arith.select %96, %97, %92 : vector<8x8xi1>, vector<8x8xf32>
    %cst_62 = arith.constant dense<0xFF800000> : vector<8xf32>
    %99 = vector.multi_reduction <maximumf>, %98, %cst_62 [1] : vector<8x8xf32> to vector<8xf32>
    %100 = vector.shape_cast %99 : vector<8xf32> to vector<8x1xf32>
    %101 = vector.broadcast %100 : vector<8x1xf32> to vector<8x8xf32>
    %102 = arith.subf %98, %101 : vector<8x8xf32>
    %103 = math.exp %102 : vector<8x8xf32>
    %cst_63 = arith.constant dense<0.000000e+00> : vector<8xf32>
    %104 = vector.multi_reduction <add>, %103, %cst_63 [1] : vector<8x8xf32> to vector<8xf32>
    %105 = vector.shape_cast %104 : vector<8xf32> to vector<8x1xf32>
    %106 = vector.broadcast %105 : vector<8x1xf32> to vector<8x8xf32>
    %107 = arith.divf %103, %106 : vector<8x8xf32>
    %c0_64 = arith.constant 0 : index
    %c3 = arith.constant 3 : index
    %c0_65 = arith.constant 0 : index
    %c0_66 = arith.constant 0 : index
    %108 = vector.load %arg10[%c0_64, %c3, %c0_65, %c0_66] : memref<1x4x8x8xf32, #tpu.memory_space<vmem>>, vector<1x1x8x8xf32>
    %109 = vector.shape_cast %108 : vector<1x1x8x8xf32> to vector<8x8xf32>
    %110 = vector.shape_cast %107 : vector<8x8xf32> to vector<1x1x8x8xf32>
    tpu.vector_store %arg10[%c0_64, %c3, %c0_65, %c0_66], %110 {strides = array<i32>} : memref<1x4x8x8xf32, #tpu.memory_space<vmem>>, vector<1x1x8x8xf32>,
    %cst_67 = arith.constant dense<0.000000e+00> : vector<8x8xf32>
    %111 = tpu.matmul %107, %89, %cst_67 {dimension_numbers = #tpu.dot_dimension_numbers<[1], [0], [0], [1], [0, 0, 1, 1], [], []>} : vector<8x8xf32>, vector<8x8xf32>, vector<8x8xf32> -> vector<8x8xf32>
    %112 = tpu.concatenate %36, %61, %86, %111 in 1 : vector<8x8xf32>, vector<8x8xf32>, vector<8x8xf32>, vector<8x8xf32> -> vector<8x32xf32>
    %c0_68 = arith.constant 0 : index
    %c0_69 = arith.constant 0 : index
    %113 = vector.load %arg8[%c0_68, %c0_69] : memref<32x32xf32, #tpu.memory_space<vmem>>, vector<32x32xf32>
    %cst_70 = arith.constant dense<0.000000e+00> : vector<8x32xf32>
    %114 = tpu.matmul %112, %113, %cst_70 {dimension_numbers = #tpu.dot_dimension_numbers<[1], [0], [0], [1], [0, 0, 1, 1], [], []>} : vector<8x32xf32>, vector<32x32xf32>, vector<8x32xf32> -> vector<8x32xf32>
    %c0_71 = arith.constant 0 : index
    %c0_72 = arith.constant 0 : index
    %c0_73 = arith.constant 0 : index
    %115 = vector.load %arg9[%c0_71, %c0_72, %c0_73] : memref<1x8x32xf32, #tpu.memory_space<vmem>>, vector<1x8x32xf32>
    %116 = vector.shape_cast %115 : vector<1x8x32xf32> to vector<8x32xf32>
    %117 = vector.shape_cast %114 : vector<8x32xf32> to vector<1x8x32xf32>
    tpu.vector_store %arg9[%c0_71, %c0_72, %c0_73], %117 {strides = array<i32>} : memref<1x8x32xf32, #tpu.memory_space<vmem>>, vector<1x8x32xf32>,
    return
  }
  func.func @transform_0(%arg0: i32) -> (i32, i32, i32) {
    %c0_i32 = arith.constant 0 : i32
    %c0_i32_0 = arith.constant 0 : i32
    %c0_i32_1 = arith.constant 0 : i32
    return %arg0, %c0_i32, %c0_i32_0 : i32, i32, i32
  }
  func.func @transform_1(%arg0: i32) -> (i32, i32, i32) {
    %c0_i32 = arith.constant 0 : i32
    %c0_i32_0 = arith.constant 0 : i32
    %c0_i32_1 = arith.constant 0 : i32
    return %arg0, %c0_i32, %c0_i32_0 : i32, i32, i32
  }
  func.func @transform_2(%arg0: i32) -> (i32, i32, i32) {
    %c0_i32 = arith.constant 0 : i32
    %c0_i32_0 = arith.constant 0 : i32
    %c0_i32_1 = arith.constant 0 : i32
    return %arg0, %c0_i32, %c0_i32_0 : i32, i32, i32
  }
  func.func @transform_3(%arg0: i32) -> (i32, i32, i32) {
    %c0_i32 = arith.constant 0 : i32
    %c0_i32_0 = arith.constant 0 : i32
    %c0_i32_1 = arith.constant 0 : i32
    return %arg0, %c0_i32, %c0_i32_0 : i32, i32, i32
  }
  func.func @transform_4(%arg0: i32) -> (i32, i32) {
    %c0_i32 = arith.constant 0 : i32
    %c0_i32_0 = arith.constant 0 : i32
    %c0_i32_1 = arith.constant 0 : i32
    return %c0_i32, %c0_i32_0 : i32, i32
  }
  func.func @transform_5(%arg0: i32) -> (i32, i32) {
    %c0_i32 = arith.constant 0 : i32
    %c0_i32_0 = arith.constant 0 : i32
    %c0_i32_1 = arith.constant 0 : i32
    return %c0_i32, %c0_i32_0 : i32, i32
  }
  func.func @transform_6(%arg0: i32) -> (i32, i32) {
    %c0_i32 = arith.constant 0 : i32
    %c0_i32_0 = arith.constant 0 : i32
    %c0_i32_1 = arith.constant 0 : i32
    return %c0_i32, %c0_i32_0 : i32, i32
  }
  func.func @transform_7(%arg0: i32) -> (i32, i32) {
    %c0_i32 = arith.constant 0 : i32
    %c0_i32_0 = arith.constant 0 : i32
    %c0_i32_1 = arith.constant 0 : i32
    return %c0_i32, %c0_i32_0 : i32, i32
  }
  func.func @transform_8(%arg0: i32) -> (i32, i32, i32) {
    %c0_i32 = arith.constant 0 : i32
    %c0_i32_0 = arith.constant 0 : i32
    %c0_i32_1 = arith.constant 0 : i32
    return %arg0, %c0_i32, %c0_i32_0 : i32, i32, i32
  }
  func.func @transform_9(%arg0: i32) -> (i32, i32, i32, i32) {
    %c0_i32 = arith.constant 0 : i32
    %c0_i32_0 = arith.constant 0 : i32
    %c0_i32_1 = arith.constant 0 : i32
    %c0_i32_2 = arith.constant 0 : i32
    return %arg0, %c0_i32, %c0_i32_0, %c0_i32_1 : i32, i32, i32, i32
  }
}

</mosaic_0001>

<bundles_post_ra>
// kernel: tpu_custom_call.1
= control target key start
LH: loop header
LB: loop body
LE: loop exit
PB: predicated region body
PF: predicated region fallthrough
CT: control target
= control target key end

     0   :  { %s3081_s0 = inlined_call_operand.hbm [shape: f32[2,8,32], index: 0, kind: input, shape index: {}]   ;;  %s3082_s1 = inlined_call_operand.hbm [shape: f32[2,8,32], index: 1, kind: input, shape index: {}]   ;;  %s3083_s2 = inlined_call_operand.hbm [shape: f32[2,8,32], index: 2, kind: input, shape index: {}]   ;;  %s3084_s3 = inlined_call_operand.hbm [shape: s32[2,8,8], index: 3, kind: input, shape index: {}]   ;;  %s3085_s4 = inlined_call_operand.hbm [shape: f32[32,32], index: 4, kind: input, shape index: {}]   ;;  %s3086_s5 = inlined_call_operand.hbm [shape: f32[32,32], index: 5, kind: input, shape index: {}]   ;;  %s3087_s6 = inlined_call_operand.hbm [shape: f32[32,32], index: 6, kind: input, shape index: {}]   ;;  %s3088_s7 = inlined_call_operand.hbm [shape: f32[32,32], index: 7, kind: input, shape index: {}]   ;;  %s3089_s8 = inlined_call_operand.hbm [shape: f32[2,8,32], index: 8, kind: output, shape index: {0}]   ;;  %s3090_s9 = inlined_call_operand.hbm [shape: f32[2,4,8,8], index: 9, kind: output, shape index: {1}]  }
   0x1   :  { %3117 = sst [smem:[#allocation32_spill]] %s3082_s1 }
   0x2   :  { %3118 = sst [smem:[#allocation33_spill]] %s3085_s4 }
   0x3   :  { %3119 = sst [smem:[#allocation34_spill]] %s3086_s5 }
   0x4   :  { %3120 = sst [smem:[#allocation35_spill]] %s3089_s8 }
   0x5   :  { %3121 = sst [smem:[#allocation36_spill]] %s3090_s9 }
   0x6   :  { %15 = vsyncpa [#allocation3], 0 }
   0x7   :  { %17 = vsyncpa [#allocation3 + $0x1], 0 }
   0x8   :  { %18 = vsyncpa [#allocation6], 0 }
   0x9   :  { %20 = vsyncpa [#allocation6 + $0x1], 0 }
   0xa   :  { %21 = vsyncpa [#allocation9], 0 }
   0xb   :  { %23 = vsyncpa [#allocation9 + $0x1], 0 }
   0xc   :  { %24 = vsyncpa [#allocation12], 0 }
   0xd   :  { %25 = vsyncpa [#allocation15], 0 }
   0xe   :  { %26 = vsyncpa [#allocation4], 0 }
   0xf   :  { %28 = vsyncpa [#allocation4 + $0x1], 0 }
  0x10   :  { %29 = vsyncpa [#allocation18], 0 }
  0x11   :  { %31 = vsyncpa [#allocation18 + $0x1], 0  ;;  %s2532_s30 = smov 0   ;;  %s2534_s10 = smov 0  }
  0x12   :  { %s2536_s11 = smov 0   ;;  %s2538_s12 = smov 0  }
  0x13 LB: > { %3122 = sst [smem:[#allocation27_spill]] %s2446_s30  ;;  %s2553_s13 = sadd.s32 4294967295, %s2458_s12   ;;  %s2458_s12 = sphi %s2538_s12, %s3165_s12   ;;  %s2454_s11 = sphi %s2536_s11, %s3169_s11   ;;  %s2450_s10 = sphi %s2534_s10, %s3168_s10   ;;  %s2446_s30 = sphi %s2532_s30, %s3167_s30  }
  0x14   : > { %s1776_s14 = sadd.s32 4294967294, %s2458_s12   ;;  %p57_p0 = scmp.ne.s32.totalorder %s2450_s10, %s2446_s30 }
  0x15   : > { %p3091_p1 = scmp.eq.s32.totalorder %s2553_s13, 0  ;;  %p249_p3 = scmp.eq.s32.totalorder %s1776_s14, 1 }
  0x16   : > { %p1777_p5 = scmp.ge.s32.totalorder %s2458_s12, 1  ;;  %p282_p7 = scmp.lt.s32.totalorder %s2458_s12, 3 }
  0x17   : > { %p2562_p4 = por %p3091_p1, %p57_p0  ;;  %p2567_p6 = por %p249_p3, %p57_p0 }
  0x18   : > { %p2572_p8 = pnand %p1777_p5, %p282_p7  ;;  %s2460_s18 = smov [#allocation10]  }
  0x19   : > { %s3123_s15 = scalar_select %p2562_p4, 1, 0 }
  0x1a   : > { %s3124_s16 = scalar_select %p2567_p6, 1, 0 }
  0x1b   : > { %s3126_s17 = scalar_select %p2572_p8, 1, 0 }
  0x1c   : > { %3125 = sst [smem:[#allocation28_spill]] %s3124_s16  ;;  %s294_s19 = sshll.u32 %s2460_s18, 4  ;;  %s2576_s19 = int_to_ptr.vmem [resolvable:$true] %s294_s19 }
  0x1d   : > { %p2001_p9 = pneg %p2572_p8  ;;  %s2461_s21 = smov [#allocation11]  }
  0x1e   : > { %s307_s22 = sshll.u32 %s2461_s21, 4  ;;  %s3128_s4 = sld [smem:[#allocation33_spill]]  ;;  %s2587_s22 = int_to_ptr.vmem [resolvable:$true] %s307_s22 }
  0x1f   : > { %p2583_p11 = pnand %p2001_p9, %p3091_p1 }
  0x21   : > { %s3127_s20 = scalar_select %p2583_p11, 1, 0 }
  0x22   : > { %p2597_p13 = pneg %p2583_p11 }
  0x24   : > { %s2108_s25 = scalar_lea.hbm %s3128_s4, 512 }
  0x25   : > { %p2109_p12 = scmp.ne.s32.totalorder %s3128_s4, %s2108_s25  ;;  %p2115_p5 = scmp.lt.u32.totalorder %s2108_s25, %s3128_s4 }
  0x26   : > { %s3129_s28 = scalar_select %p2597_p13, 1, 0 }
  0x27   : > { %p2111_p0 = pnand %p2597_p13, %p2109_p12 }
  0x29   : > { %p2112_p3 = pneg %p2111_p0 }
  0x2b   : > { %p2117_p7 = pnand %p2115_p5, %p2112_p3 }
  0x2d   : > { %2120 = shalt.err (!%p2117_p7)
}
  0x2e   : > { %s2121_s18 = scalar_lea.vmem %s2576_s19, 512  ;;  %p2129_p2 = scmp.lt.s32.totalorder %s2576_s19, %s2576_s19 }
  0x2f   : > { %p2122_p9 = scmp.ne.s32.totalorder %s2576_s19, %s2121_s18  ;;  %p2130_p6 = scmp.lt.s32.totalorder %s2121_s18, %s2121_s18 }
  0x31   : > { %p2124_p10 = pnand %p2122_p9, %p2597_p13  ;;  %p2131_p12 = por %p2130_p6, %p2129_p2 }
  0x33   : > { %p2125_p1 = pneg %p2124_p10 }
  0x35   : > { %p2132_p0 = pnand %p2131_p12, %p2125_p1 }
  0x37   : > { %2135 = shalt.err (!%p2132_p0)
}
  0x38   : > { %s3095_s21 = smov 128   ;;  %s3097_s23 = smov 8  }
  0x39   : > { %2004 = dma.hbm_to_vmem [thread:$0]  (!%p2583_p11), %s3128_s4, 512, %s2576_s19, [#allocation9], %s3095_s21, %s3095_s21, %s3097_s23  }
  0x3a   : > { %s3130_s5 = sld [smem:[#allocation34_spill]] }
  0x40   : > { %s2136_s29 = scalar_lea.hbm %s3130_s5, 512 }
  0x41   : > { %p2137_p1 = scmp.ne.s32.totalorder %s3130_s5, %s2136_s29  ;;  %p2143_p10 = scmp.lt.u32.totalorder %s2136_s29, %s3130_s5 }
  0x43   : > { %p2139_p2 = pnand %p2137_p1, %p2597_p13 }
  0x45   : > { %p2140_p6 = pneg %p2139_p2 }
  0x47   : > { %p2145_p3 = pnand %p2143_p10, %p2140_p6 }
  0x49   : > { %2148 = shalt.err (!%p2145_p3)
}
  0x4a   : > { %s2149_s19 = scalar_lea.vmem %s2587_s22, 512  ;;  %p2157_p12 = scmp.lt.s32.totalorder %s2587_s22, %s2587_s22 }
  0x4b   : > { %p2150_p5 = scmp.ne.s32.totalorder %s2587_s22, %s2149_s19  ;;  %p2158_p0 = scmp.lt.s32.totalorder %s2149_s19, %s2149_s19 }
  0x4d   : > { %p2152_p7 = pnand %p2150_p5, %p2597_p13  ;;  %p2159_p1 = por %p2158_p0, %p2157_p12 }
  0x4f   : > { %p2153_p9 = pneg %p2152_p7 }
  0x51   : > { %p2160_p2 = pnand %p2159_p1, %p2153_p9 }
  0x53   : > { %2163 = shalt.err (!%p2160_p2)
}
  0x54   : > { %2007 = dma.hbm_to_vmem [thread:$0]  (!%p2583_p11), %s3130_s5, 512, %s2587_s22, [#allocation12], %s3095_s21, %s3095_s21, %s3097_s23  }
  0x55   : > { %s2648_s24 = sadd.s32 1, %s2458_s12   ;;  %s44_s25 = sadd.s32 1, %s2454_s11 }
  0x56   : > { %3131 = sst [smem:[#allocation29_spill]] %s2648_s24  ;;  %s41_s26 = ssub.s32 %s2458_s12, %s2648_s24 }
  0x57   : > { %p51_p6 = scmp.ne.s32.totalorder %s2454_s11, %s2450_s10  ;;  %p42_p10 = scmp.eq.s32.totalorder %s41_s26, 0 }
  0x58   : > { %p52_p3 = scmp.eq.s32.totalorder %s2458_s12, 0  ;;  %p3132_p5 = scmp.eq.s32.totalorder %s2553_s13, 1 }
  0x59   : > { %p2038_p9 = scmp.lt.s32.totalorder %s2458_s12, 2  ;;  %s3094_s14 = sand.u32 1, %s2454_s11  }
  0x5a   : > { %p2658_p7 = por %p3132_p5, %p51_p6  ;;  %p53_p12 = por %p52_p3, %p51_p6 }
  0x5b   : > { %s2664_s29 = scalar_select %p42_p10, %s2454_s11, %s44_s25  }
  0x5c   : > { %s3133_s27 = scalar_select %p2658_p7, 1, 0 }
  0x5d   : > { %3135 = sst [smem:[#allocation31_spill]] %s2664_s29  ;;  %s2669_s22 = sshll.u32 %s3094_s14, 3 }
  0x5e   : > { %3134 = sst [smem:[#allocation30_spill]] %s3133_s27  ;;  %s2672_s18 = sshll.u32 %s2458_s12, 7 }
  0x5f   : > { %p2674_p0 = pnand %p2038_p9, %p53_p12  ;;  %s3103_s30 = sand.u32 1, %s2458_s12  }
  0x60   : > { %s3137_s1 = sld [smem:[#allocation32_spill]]  ;;  %s369_s14 = scalar_lea.vmem [#allocation5], %s2669_s22 }
  0x61   : > { %s3136_s19 = scalar_select %p2674_p0, 1, 0 }
  0x62   : > { %s376_s21 = sshll.u32 %s369_s14, 4  ;;  %s2690_s23 = scalar_lea.sflag [#allocation6], %s3103_s30  ;;  %s2686_s21 = int_to_ptr.vmem [resolvable:$true] %s376_s21 }
  0x63   : > { %p2696_p2 = pneg %p2674_p0 }
  0x65   : > { %s3138_s5 = scalar_select %p2696_p2, 1, 0 }
  0x66   : > { %s2683_s25 = scalar_lea.hbm %s3137_s1, %s2672_s18  ;;  %s2169_s14 = scalar_lea.hbm %s3137_s1, 256 }
  0x67   : > { %s2164_s4 = scalar_lea.hbm %s2683_s25, 128  ;;  %p2170_p3 = scmp.lt.u32.totalorder %s2683_s25, %s3137_s1 }
  0x68   : > { %p2165_p1 = scmp.ne.s32.totalorder %s2683_s25, %s2164_s4  ;;  %p2171_p5 = scmp.lt.u32.totalorder %s2169_s14, %s2164_s4 }
  0x69   : > { %p2173_p12 = scmp.lt.u32.totalorder %s2164_s4, %s2683_s25 }
  0x6a   : > { %p2167_p6 = pnand %p2696_p2, %p2165_p1  ;;  %p2172_p9 = por %p2171_p5, %p2170_p3 }
  0x6c   : > { %p2168_p10 = pneg %p2167_p6  ;;  %p2174_p7 = por %p2173_p12, %p2172_p9 }
  0x6e   : > { %p2175_p4 = pnand %p2174_p7, %p2168_p10 }
  0x70   : > { %2178 = shalt.err (!%p2175_p4)
}
  0x71   : > { %s2179_s30 = scalar_lea.vmem %s2686_s21, 128  ;;  %s2464_s16 = smov [#allocation5]  }
  0x72   : > { %p2180_p1 = scmp.ne.s32.totalorder %s2686_s21, %s2179_s30  ;;  %s2184_s26 = sshll.u32 %s2464_s16, 4  ;;  %s2185_s26 = int_to_ptr.vmem [resolvable:$false] %s2184_s26 }
  0x73   : > { %s2186_s24 = scalar_lea.vmem %s2185_s26, 256  ;;  %p2187_p11 = scmp.lt.s32.totalorder %s2686_s21, %s2185_s26 }
  0x74   : > { %p2182_p6 = pnand %p2180_p1, %p2696_p2  ;;  %p2188_p13 = scmp.lt.s32.totalorder %s2186_s24, %s2179_s30 }
  0x76   : > { %p2183_p8 = pneg %p2182_p6  ;;  %p2189_p3 = por %p2188_p13, %p2187_p11 }
  0x78   : > { %p2190_p5 = pnand %p2189_p3, %p2183_p8 }
  0x7a   : > { %2193 = shalt.err (!%p2190_p5)
}
  0x7b   : > { %2020 = dma.hbm_to_vmem [thread:$0]  (!%p2674_p0), %s2683_s25, 128, %s2686_s21, %s2690_s23  }
  0x7c   : > { %s2465_s4 = smov [#allocation13]   ;;  %s2466_s14 = smov [#allocation14]  }
  0x7d   : > { %s320_s29 = sshll.u32 %s2465_s4, 4  ;;  %s333_s1 = sshll.u32 %s2466_s14, 4  ;;  %s321_s29 = int_to_ptr.vmem [resolvable:$true] %s320_s29  ;;  %s334_s1 = int_to_ptr.vmem [resolvable:$true] %s333_s1 }
  0x7e   : > { %s2194_s26 = scalar_lea.hbm %s3087_s6, 512  ;;  %p3139_p8 = scmp.ne.s32.totalorder %s3129_s28, 0 }
  0x7f   : > { %p2195_p4 = scmp.ne.s32.totalorder %s3087_s6, %s2194_s26  ;;  %p2201_p7 = scmp.lt.u32.totalorder %s2194_s26, %s3087_s6 }
  0x81   : > { %p2197_p11 = pnand %p2195_p4, %p3139_p8 }
  0x83   : > { %p2198_p13 = pneg %p2197_p11 }
  0x85   : > { %p2203_p10 = pnand %p2201_p7, %p2198_p13 }
  0x87   : > { %2206 = shalt.err (!%p2203_p10)
}
  0x88   : > { %s2207_s21 = scalar_lea.vmem %s321_s29, 512  ;;  %p2215_p6 = scmp.lt.s32.totalorder %s321_s29, %s321_s29 }
  0x89   : > { %p2208_p9 = scmp.ne.s32.totalorder %s321_s29, %s2207_s21  ;;  %p2216_p3 = scmp.lt.s32.totalorder %s2207_s21, %s2207_s21 }
  0x8b   : > { %p2210_p12 = pnand %p2208_p9, %p3139_p8  ;;  %p2217_p5 = por %p2216_p3, %p2215_p6 }
  0x8d   : > { %p2211_p1 = pneg %p2210_p12 }
  0x8f   : > { %p2218_p0 = pnand %p2217_p5, %p2211_p1 }
  0x91   : > { %2221 = shalt.err (!%p2218_p0)
}
  0x92   : > { %p3140_p4 = scmp.ne.s32.totalorder %s3127_s20, 0  ;;  %s3141_s8 = smov 8  }
  0x93   : > { %s3142_s25 = smov 128   ;;  %s2222_s16 = scalar_lea.hbm %s3088_s7, 512 }
  0x94   : > { %2010 = dma.hbm_to_vmem [thread:$0]  (!%p3140_p4), %s3087_s6, 512, %s321_s29, [#allocation12], %s3142_s25, %s3142_s25, %s3141_s8  }
  0x95   : > { %p2223_p11 = scmp.ne.s32.totalorder %s3088_s7, %s2222_s16  ;;  %p2229_p7 = scmp.lt.u32.totalorder %s2222_s16, %s3088_s7 }
  0x97   : > { %p2225_p0 = pnand %p2223_p11, %p3139_p8 }
  0x99   : > { %p2226_p13 = pneg %p2225_p0 }
  0x9b   : > { %p2231_p10 = pnand %p2229_p7, %p2226_p13 }
  0x9d   : > { %2234 = shalt.err (!%p2231_p10)
}
  0x9e   : > { %s2235_s9 = scalar_lea.vmem %s334_s1, 512  ;;  %p2243_p6 = scmp.lt.s32.totalorder %s334_s1, %s334_s1 }
  0x9f   : > { %p2236_p9 = scmp.ne.s32.totalorder %s334_s1, %s2235_s9  ;;  %p2244_p3 = scmp.lt.s32.totalorder %s2235_s9, %s2235_s9 }
  0xa1   : > { %p2238_p12 = pnand %p2236_p9, %p3139_p8  ;;  %p2245_p5 = por %p2244_p3, %p2243_p6 }
  0xa3   : > { %p2239_p1 = pneg %p2238_p12 }
  0xa5   : > { %p2246_p2 = pnand %p2245_p5, %p2239_p1 }
  0xa7   : > { %2249 = shalt.err (!%p2246_p2)
}
  0xa8   : > { %2013 = dma.hbm_to_vmem [thread:$0]  (!%p3140_p4), %s3088_s7, 512, %s334_s1, [#allocation15], %s3142_s25, %s3142_s25, %s3141_s8  }
  0xa9   : > { %s2766_s14 = scalar_lea.hbm %s3081_s0, %s2672_s18  ;;  %s351_s20 = scalar_lea.vmem [#allocation2], %s2669_s22 }
  0xaa   : > { %s358_s16 = sshll.u32 %s351_s20, 4  ;;  %s2775_s24 = scalar_lea.hbm %s3083_s2, %s2672_s18  ;;  %s2769_s16 = int_to_ptr.vmem [resolvable:$true] %s358_s16 }
  0xab   : > { %s3143_s21 = sand.u32 1, %s2454_s11   ;;  %s2250_s8 = scalar_lea.hbm %s2766_s14, 128 }
  0xac   : > { %s348_s1 = scalar_lea.sflag [#allocation3], %s3143_s21  ;;  %p2251_p2 = scmp.ne.s32.totalorder %s2766_s14, %s2250_s8 }
  0xad   : > { %p3144_p8 = scmp.ne.s32.totalorder %s3138_s5, 0  ;;  %s2255_s29 = scalar_lea.hbm %s3081_s0, 256 }
  0xae   : > { %p2256_p0 = scmp.lt.u32.totalorder %s2766_s14, %s3081_s0  ;;  %p2257_p13 = scmp.lt.u32.totalorder %s2255_s29, %s2250_s8 }
  0xaf   : > { %p2253_p4 = pnand %p2251_p2, %p3144_p8  ;;  %p2259_p10 = scmp.lt.u32.totalorder %s2250_s8, %s2766_s14 }
  0xb0   : > { %p2258_p7 = por %p2257_p13, %p2256_p0 }
  0xb1   : > { %p2254_p11 = pneg %p2253_p4 }
  0xb2   : > { %p2260_p9 = por %p2259_p10, %p2258_p7 }
  0xb4   : > { %p2261_p12 = pnand %p2260_p9, %p2254_p11 }
  0xb6   : > { %2264 = shalt.err (!%p2261_p12)
}
  0xb7   : > { %s2265_s4 = scalar_lea.vmem %s2769_s16, 128  ;;  %s2467_s20 = smov [#allocation2]  }
  0xb8   : > { %p2266_p1 = scmp.ne.s32.totalorder %s2769_s16, %s2265_s4  ;;  %s2270_s26 = sshll.u32 %s2467_s20, 4  ;;  %s2271_s26 = int_to_ptr.vmem [resolvable:$false] %s2270_s26 }
  0xb9   : > { %s2272_s30 = scalar_lea.vmem %s2271_s26, 256  ;;  %p2273_p5 = scmp.lt.s32.totalorder %s2769_s16, %s2271_s26 }
  0xba   : > { %p2268_p6 = pnand %p2266_p1, %p3144_p8  ;;  %p2274_p2 = scmp.lt.s32.totalorder %s2272_s30, %s2265_s4 }
  0xbc   : > { %p2269_p3 = pneg %p2268_p6  ;;  %p2275_p4 = por %p2274_p2, %p2273_p5 }
  0xbe   : > { %p2276_p0 = pnand %p2275_p4, %p2269_p3 }
  0xc0   : > { %2279 = shalt.err (!%p2276_p0)
}
  0xc1   : > { %p3145_p11 = scmp.ne.s32.totalorder %s3136_s19, 0  ;;  %s387_s21 = scalar_lea.vmem [#allocation7], %s2669_s22 }
  0xc2   : > { %s394_s8 = sshll.u32 %s387_s21, 4  ;;  %s2805_s29 = scalar_lea.hbm %s3084_s3, %s2672_s18  ;;  %s395_s8 = int_to_ptr.vmem [resolvable:$true] %s394_s8 }
  0xc3   : > { %2017 = dma.hbm_to_vmem [thread:$0]  (!%p3145_p11), %s2766_s14, 128, %s2769_s16, %s348_s1  }
  0xc4   : > { %s2280_s27 = scalar_lea.hbm %s2775_s24, 128  ;;  %s2285_s20 = scalar_lea.hbm %s3083_s2, 256 }
  0xc5   : > { %p2281_p13 = scmp.ne.s32.totalorder %s2775_s24, %s2280_s27  ;;  %p2286_p9 = scmp.lt.u32.totalorder %s2775_s24, %s3083_s2 }
  0xc6   : > { %p2287_p12 = scmp.lt.u32.totalorder %s2285_s20, %s2280_s27  ;;  %p2289_p6 = scmp.lt.u32.totalorder %s2280_s27, %s2775_s24 }
  0xc7   : > { %p2283_p7 = pnand %p2281_p13, %p3144_p8 }
  0xc8   : > { %p2288_p1 = por %p2287_p12, %p2286_p9 }
  0xc9   : > { %p2284_p10 = pneg %p2283_p7 }
  0xca   : > { %p2290_p3 = por %p2289_p6, %p2288_p1 }
  0xcc   : > { %p2291_p5 = pnand %p2290_p3, %p2284_p10 }
  0xce   : > { %2294 = shalt.err (!%p2291_p5)
}
  0xcf   : > { %s2295_s18 = scalar_lea.vmem %s395_s8, 128  ;;  %s2468_s14 = smov [#allocation7]  }
  0xd0   : > { %p2296_p2 = scmp.ne.s32.totalorder %s395_s8, %s2295_s18  ;;  %s2300_s16 = sshll.u32 %s2468_s14, 4  ;;  %s2301_s16 = int_to_ptr.vmem [resolvable:$false] %s2300_s16 }
  0xd1   : > { %s2302_s1 = scalar_lea.vmem %s2301_s16, 256  ;;  %p2303_p13 = scmp.lt.s32.totalorder %s395_s8, %s2301_s16 }
  0xd2   : > { %p2298_p4 = pnand %p2296_p2, %p3144_p8  ;;  %p2304_p7 = scmp.lt.s32.totalorder %s2302_s1, %s2295_s18 }
  0xd4   : > { %p2299_p0 = pneg %p2298_p4  ;;  %p2305_p11 = por %p2304_p7, %p2303_p13 }
  0xd6   : > { %p2306_p9 = pnand %p2305_p11, %p2299_p0 }
  0xd8   : > { %2309 = shalt.err (!%p2306_p9)
}
  0xd9   : > { %p3146_p12 = scmp.ne.s32.totalorder %s3136_s19, 0  ;;  %s405_s21 = scalar_lea.vmem [#allocation8], %s2669_s22 }
  0xda   : > { %s412_s25 = sshll.u32 %s405_s21, 4  ;;  %s3147_s9 = sand.u32 1, %s2458_s12   ;;  %s413_s25 = int_to_ptr.vmem [resolvable:$true] %s412_s25 }
  0xdb   : > { %2023 = dma.hbm_to_vmem [thread:$0]  (!%p3146_p12), %s2775_s24, 128, %s395_s8, %s2690_s23  }
  0xdc   : > { %s402_s27 = scalar_lea.sflag [#allocation9], %s3147_s9  ;;  %s2310_s28 = scalar_lea.hbm %s2805_s29, 128 }
  0xdd   : > { %p2311_p11 = scmp.ne.s32.totalorder %s2805_s29, %s2310_s28  ;;  %s2315_s26 = scalar_lea.hbm %s3084_s3, 256 }
  0xde   : > { %p2316_p6 = scmp.lt.u32.totalorder %s2805_s29, %s3084_s3  ;;  %p2317_p3 = scmp.lt.u32.totalorder %s2315_s26, %s2310_s28 }
  0xdf   : > { %p2313_p10 = pnand %p2311_p11, %p3144_p8  ;;  %p2319_p2 = scmp.lt.u32.totalorder %s2310_s28, %s2805_s29 }
  0xe0   : > { %p2318_p5 = por %p2317_p3, %p2316_p6 }
  0xe1   : > { %p2314_p1 = pneg %p2313_p10 }
  0xe2   : > { %p2320_p4 = por %p2319_p2, %p2318_p5 }
  0xe4   : > { %p2321_p0 = pnand %p2320_p4, %p2314_p1 }
  0xe6   : > { %2324 = shalt.err (!%p2321_p0)
}
  0xe7   : > { %s2325_s23 = scalar_lea.vmem %s413_s25, 128  ;;  %s2469_s22 = smov [#allocation8]  }
  0xe8   : > { %p2326_p13 = scmp.ne.s32.totalorder %s413_s25, %s2325_s23  ;;  %s2330_s24 = sshll.u32 %s2469_s22, 4  ;;  %s2331_s24 = int_to_ptr.vmem [resolvable:$false] %s2330_s24 }
  0xe9   : > { %s2332_s8 = scalar_lea.vmem %s2331_s24, 256  ;;  %p2333_p11 = scmp.lt.s32.totalorder %s413_s25, %s2331_s24 }
  0xea   : > { %p2328_p7 = pnand %p2326_p13, %p3144_p8  ;;  %p2334_p10 = scmp.lt.s32.totalorder %s2332_s8, %s2325_s23 }
  0xec   : > { %p2329_p9 = pneg %p2328_p7  ;;  %p2335_p12 = por %p2334_p10, %p2333_p11 }
  0xee   : > { %p2336_p3 = pnand %p2335_p12, %p2329_p9 }
  0xf0   : > { %2339 = shalt.err (!%p2336_p3)
}
  0xf1   : > { %p3148_p6 = scmp.ne.s32.totalorder %s3136_s19, 0  ;;  %p3149_p1 = scmp.ne.s32.totalorder %s3126_s17, 0 }
  0xf2   : > { %s2848_s5 = sand.u32 (!%p3149_p1), 1, %s2450_s10   ;;  %p3150_p8 = scmp.ne.s32.totalorder (!%p3149_p1), %s3123_s15, 0 }
  0xf3   : > { %2026 = dma.hbm_to_vmem [thread:$0]  (!%p3148_p6), %s2805_s29, 128, %s413_s25, %s402_s27  }
  0xf4   : > { %421 = sbr.rel (%p3149_p1) target bundleno = 2174 (0x87e), region = 52  ;;  %s2851_s14 = sshll.u32 (!%p3149_p1), %s2848_s5, 3 }
  0xf5   : > { %s424_s16 = scalar_lea.sflag (!%p3149_p1), [#allocation3], %s2848_s5  ;;  %s427_s1 = scalar_lea.vmem (!%p3149_p1), [#allocation2], %s2851_s14 }
  0xfb   : > { %2413 = dma.done.wait (%p3150_p8), %s424_s16, 128  }
  0xfc   : > { %2415 = vsyncadd (%p3150_p8), %s424_s16, 4294967168  ;;  %s432_s17 = sand.u32 1, %s2553_s13   ;;  %s436_s29 = scalar_lea.vmem [#allocation5], %s2851_s14 }
  0xfd   : > { %s433_s19 = scalar_lea.sflag [#allocation6], %s432_s17 }
  0xfe   : > { %2417 = dma.done.wait (%p3150_p8), %s433_s19, 256  }
  0xff   : > { %2419 = vsyncadd (%p3150_p8), %s433_s19, 4294967040  ;;  %s445_s21 = scalar_lea.vmem [#allocation7], %s2851_s14  ;;  %s451_s25 = scalar_lea.sflag [#allocation9], %s432_s17 }
 0x100   : > { %s454_s9 = scalar_lea.vmem [#allocation8], %s2851_s14 }
 0x101   : > { %2421 = dma.done.wait (%p3150_p8), %s451_s25, 128  }
 0x102   : > { %2423 = vsyncadd (%p3150_p8), %s451_s25, 4294967168  ;;  %p3151_p12 = scmp.eq.s32.totalorder %s2553_s13, 0 }
 0x104   : > { %2425 = dma.done.wait (%p3151_p12), [#allocation9], 512   ;;  %p3152_p5 = pmov %p3151_p12 }
 0x106   : > { %2427 = vsyncadd (%p3152_p5), [#allocation9], 4294966784  ;;  %p3153_p2 = pmov %p3152_p5 }
 0x108   : > { %2429 = dma.done.wait (%p3153_p2), [#allocation12], 1024   ;;  %p3154_p4 = pmov %p3153_p2 }
 0x109   : > { %p3155_p0 = pmov %p3153_p2 }
 0x10a   : > { %2431 = vsyncadd (%p3154_p4), [#allocation12], 4294966272 }
 0x10b   : > { %2433 = dma.done.wait (%p3155_p0), [#allocation15], 512   ;;  %p3156_p13 = pmov %p3155_p0 }
 0x10c   : > { %v2470_v0 = vmov 0.0|0.0   ;;  %vm2471_vm0 = vmmov 0   ;;  %v2472_v1 = vmov 0.0   ;;  %v606_v2 = vld [vmem:[#allocation11] sm:$0xff]  ;;  %v607_v3 = vld [vmem:[#allocation11 + $0x8] sm:$0xff]  ;;  %v608_v7 = vld [vmem:[#allocation11 + $0x10] sm:$0xff] }
 0x10d   : > { %2435 = vsyncadd (%p3156_p13), [#allocation15], 4294966784  ;;  %1955 = vmatprep.subr.bf16.mxu1 %v2470_v0  ;;  %1949 = vmatprep.subr.bf16.mxu0 %v2470_v0  ;;  %v528_v4 = vld [vmem:[#allocation10] sm:$0xff]  ;;  %v1956_v5 = vpack.c.bf16 %v607_v3, %v606_v2  ;;  %v529_v6 = vld [vmem:[#allocation10 + $0x8] sm:$0xff]  ;;  %vm532_vm1 = vcmask 261120   ;;  %vm760_vm2 = vcmask 64512  }
 0x10e   : > { %1884 = vmatprep.mubr.msk.f32.mxu1 %vm2471_vm0, %v2472_v1  ;;  %1873 = vmatprep.mubr.msk.f32.mxu0 %vm2471_vm0, %v2472_v1  ;;  %v609_v8 = vld [vmem:[#allocation11 + $0x18] sm:$0xff]  ;;  %v1950_v9 = vpack.c.bf16 %v529_v6, %v528_v4  ;;  %v530_v10 = vld [vmem:[#allocation10 + $0x10] sm:$0xff]  ;;  %v525_v15 = vld [vmem:[%s427_s1] sm:$0xff]  ;;  %s2473_s15 = smov 120   ;;  %s2474_s27 = smov 112   ;;  %vm1453_vm4 = vcmask 130048  }
 0x10f   : > { %v531_v11 = vld [vmem:[#allocation10 + $0x18] sm:$0xff]  ;;  %1957 = vmatpush3.bf16.msra.mxu1 %v1956_v5  ;;  %v1959_v12 = vpack.c.bf16 %v609_v8, %v608_v7  ;;  %s2475_s28 = smov 104   ;;  %v683_v20 = vld [vmem:[#allocation13] sm:$0xff]  ;;  %v684_v21 = vld [vmem:[#allocation13 + $0x8] sm:$0xff]  ;;  %s1801_s4 = sshll.u32 %s2848_s5, 5  ;;  %vm1455_vm5 = vcmask 195584  }
 0x110   : > { %1951 = vmatpush3.bf16.msra.mxu0 %v1950_v9  ;;  %1958 = vmatprep.subr.bf16.mxu1 %v2470_v0  ;;  %v1953_v13 = vpack.c.bf16 %v531_v11, %v530_v10  ;;  %v526_v14 = vld [vmem:[%s436_s29] sm:$0xff]  ;;  %v1962_v23 = vpack.c.bf16 %v684_v21, %v683_v20  ;;  %v527_v26 = vld [vmem:[%s445_s21] sm:$0xff]  ;;  %s2945_s20 = scalar_lea.vmem [#allocation17], %s1801_s4  ;;  %s2476_s26 = smov 8  }
 0x111   : > { %1952 = vmatprep.subr.bf16.mxu0 %v2470_v0  ;;  %v685_v22 = vld [vmem:[#allocation13 + $0x10] sm:$0xff]  ;;  %v686_v24 = vld [vmem:[#allocation13 + $0x18] sm:$0xff]  ;;  %s2477_s30 = smov 16   ;;  %s2478_s18 = smov 24  }
 0x112   : > { %v1965_v25 = vpack.c.bf16 %v686_v24, %v685_v22  ;;  %v2922_v27 = vld [vmem:[%s454_s9] sm:$0xff]  ;;  %s3157_s23 = sld [smem:[#allocation30_spill]]  ;;  %s1828_s22 = sshll.u32 %s2553_s13, 9 }
 0x113   : > { %1960 = vmatpush3.bf16.msra.mxu1 %v1959_v12  ;;  %vm839_vm3 = vcmp.eq.s32.totalorder %v2922_v27, 0  ;;  %s1567_s24 = sshll.u32 %s2945_s20, 4  ;;  %s3158_s1 = sld [smem:[#allocation36_spill]]  ;;  %s3004_s24 = int_to_ptr.vmem [resolvable:$true] %s1567_s24 }
 0x114   : > { %1954 = vmatpush3.bf16.msra.mxu0 %v1953_v13  ;;  %1898 = vmatprep.subr.mxu1 %v2472_v1  ;;  %s1541_s19 = scalar_lea.sflag [#allocation18], %s2848_s5  ;;  %s2340_s29 = scalar_lea.vmem %s3004_s24, 512 }
 0x115   : > { %1961 = vmatprep.subr.bf16.mxu0 %v2470_v0  ;;  %p2341_p7 = scmp.ne.s32.totalorder %s3004_s24, %s2340_s29  ;;  %s2479_s21 = smov [#allocation17]  }
 0x116   : > { %1885 = vmatmul.mubr.msk.f32.vlgmr.msra.gmra.mrb[0].mxu1 %vm532_vm1, %v526_v14  ;;  %s2344_s25 = sshll.u32 %s2479_s21, 4  ;;  %s2345_s25 = int_to_ptr.vmem [resolvable:$false] %s2344_s25 }
 0x117   : > { %1874 = vmatmul.mubr.msk.f32.vlgmr.msra.gmra.mrb[0].mxu0 %vm532_vm1, %v525_v15  ;;  %1900 = vmatprep.mubr.msk.f32.mxu1 %vm2471_vm0, %v2472_v1  ;;  %s2346_s9 = scalar_lea.vmem %s2345_s25, 1024  ;;  %p2347_p3 = scmp.lt.s32.totalorder %s3004_s24, %s2345_s25 }
 0x118   : > { %1895 = vmatprep.mubr.msk.f32.mxu0 %vm2471_vm0, %v2472_v1  ;;  %1963 = vmatpush3.bf16.msra.mxu0 %v1962_v23  ;;  %p3159_p9 = scmp.ne.s32.totalorder %s3157_s23, 0  ;;  %p2348_p6 = scmp.lt.s32.totalorder %s2346_s9, %s2340_s29 }
 0x119   : > { %1964 = vmatprep.subr.bf16.mxu0 %v2470_v0  ;;  %s3002_s17 = scalar_lea.hbm %s3158_s1, %s1828_s22 }
 0x11a   : > { %p2342_p11 = pnand %p2341_p7, %p3159_p9  ;;  %p2349_p1 = por %p2348_p6, %p2347_p3 }
 0x11c   : > { %1966 = vmatpush3.bf16.msra.mxu0 %v1965_v25  ;;  %p2343_p10 = pneg %p2342_p11 }
 0x11d   : > { %1918 = vmatprep.subr.mxu0 %v2472_v1 }
 0x11e   : > { %p2350_p8 = pnand %p2349_p1, %p2343_p10 }
 0x11f   : > { %1896 = vmatmul.mubr.msk.f32.vlgmr.msra.gmra.mrb[2].mxu0 %vm532_vm1, %v527_v26 }
 0x120   : > { %1920 = vmatprep.mubr.msk.f32.mxu0 %vm2471_vm0, %v2472_v1 }
 0x1e9   : > { %v679_v16 = vpop.f32.mrb[0].mxu1 }
 0x1ea   : > { %928 = vrot.lane.b32.xlu1 %v679_v16, %s2473_s15  ;;  %v1886_v17 = vpop.f32.mrb[1].mxu1  ;;  %1899 = vmatpush3.xpose.msk.msra.mxu1 %vm760_vm2, %v679_v16  ;;  %v602_v18 = vpop.f32.mrb[0].mxu0 }
 0x1eb   : > { %v1875_v19 = vpop.f32.mrb[1].mxu0  ;;  %1903 = vmatprep.subr.mxu1 %v2472_v1 }
 0x1ed   : > { %1901 = vmatmul.mubr.msk.f32.vlgmr.msra.gmra.mrb[2].mxu1 %vm760_vm2, %v602_v18 }
 0x1ee   : > { %926 = vrot.lane.b32.xlu1 %v602_v18, %s2473_s15  ;;  %1905 = vmatprep.mubr.msk.f32.mxu1 %vm2471_vm0, %v2472_v1 }
 0x1f2   : > { %1098 = vrot.lane.b32.xlu1 %v602_v18, %s2474_s27  ;;  %v2929_v38 = vpop.f32.mrb[2].mxu0 }
 0x1f3   : > { %v1897_v39 = vpop.f32.mrb[3].mxu0  ;;  %1904 = vmatpush3.msra.mxu1 %v2929_v38 }
 0x1f4   : > { %1908 = vmatprep.subr.mxu1 %v2472_v1 }
 0x1f6   : > { %1271 = vrot.lane.b32.xlu1 %v679_v16, %s2475_s28 }
 0x1fa   : > { %1269 = vrot.lane.b32.xlu1 %v602_v18, %s2475_s28 }
 0x25c   : > { %v929_v40 = vpop.permute.xlu1 %928 }
 0x260   : > { %v927_v41 = vpop.permute.xlu1 %926 }
 0x264   : > { %v1099_v42 = vpop.permute.xlu1 %1098 }
 0x268   : > { %v1272_v45 = vpop.permute.xlu1 %1271 }
 0x26c   : > { %v1270_v47 = vpop.permute.xlu1 %1269 }
 0x2c0   : > { %v833_v28 = vpop.f32.mrb[2].mxu1 }
 0x2c1   : > { %v837_v29 = vmul.f32 0.35355338, %v833_v28  ;;  %v1902_v30 = vpop.f32.mrb[3].mxu1 }
 0x2c3   : > { %v840_v31 = vsel %vm839_vm3, -1e+09, %v837_v29 }
 0x2c4   : > { %v841_v32 = vsel %vm760_vm2, %v840_v31, -inf }
 0x2c5   : > { %842 = vmax.xlane.f32.xlu0 %v841_v32  ;;  %v1458_v32 = vld [vmem:[#allocation14 + $0x8] sm:$0xff] }
 0x352   : > { %v843_v33 = vpop.xlane.xlu0 %842 }
 0x353   : > { %v844_v34 = vsub.f32 %v840_v31, %v843_v33  ;;  %v1457_v31 = vld [vmem:[#allocation14] sm:$0xff] }
 0x354   : > { %v1968_v33 = vpack.c.bf16 %v1458_v32, %v1457_v31 }
 0x355   : > { %v845_v35 = vmul.f32 1.442695, %v844_v34  ;;  %v1459_v34 = vld [vmem:[#allocation14 + $0x10] sm:$0xff] }
 0x357   : > { %2092 = vpow2.f32 %v845_v35  ;;  %v1460_v35 = vld [vmem:[#allocation14 + $0x18] sm:$0xff] }
 0x361   : > { %v2093_v36 = vpop.eup %2092 }
 0x362   : > { %v847_v37 = vsel %vm760_vm2, %v2093_v36, 0.0 }
 0x363   : > { %848 = vadd.xlane.f32.xlu0 %v847_v37 }
 0x379   : > { %1100 = vrot.lane.b32.xlu0 %v679_v16, %s2474_s27 }
 0x3f0   : > { %v849_v43 = vpop.xlane.xlu0 %848 }
 0x3f1   : > { %2094 = vrcp.f32 %v849_v43 }
 0x3f4   : > { %v1101_v44 = vpop.permute.xlu0 %1100 }
 0x3f5   : > { %1919 = vmatpush3.xpose.msk.msra.mxu0 %vm760_vm2, %v1101_v44 }
 0x3f6   : > { %1928 = vmatprep.subr.mxu0 %v2472_v1 }
 0x3f8   : > { %1921 = vmatmul.mubr.msk.f32.vlgmr.msra.gmra.mrb[4].mxu0 %vm760_vm2, %v1099_v42 }
 0x3f9   : > { %1929 = vmatpush3.xpose.msk.msra.mxu0 %vm760_vm2, %v1272_v45  ;;  %1930 = vmatprep.mubr.msk.f32.mxu0 %vm2471_vm0, %v2472_v1 }
 0x3fa   : > { %1967 = vmatprep.subr.bf16.mxu0 %v2470_v0 }
 0x3fb   : > { %v2095_v46 = vpop.eup %2094 }
 0x3fc   : > { %v851_v48 = vmul.f32 %v2095_v46, %v2093_v36  ;;  %1931 = vmatmul.mubr.msk.f32.vlgmr.msra.gmra.mrb[6].mxu0 %vm760_vm2, %v1270_v47  ;;  %v1971_v36 = vpack.c.bf16 %v1460_v35, %v1459_v34 }
 0x3fd   : > { %1946 = vmatprep.mubr.msk.f32.mxu0 %vm2471_vm0, %v2472_v1  ;;  %1969 = vmatpush3.bf16.msra.mxu0 %v1968_v33 }
 0x3fe   : > { %852 = vst.msk [vmem:[%s2945_s20] sm:$0xff] %vm760_vm2, %v851_v48  ;;  %1906 = vmatmul.mubr.msk.f32.vlgmr.msra.gmra.mrb[4].mxu1 %vm760_vm2, %v851_v48  ;;  %1970 = vmatprep.subr.bf16.mxu0 %v2470_v0 }
 0x3ff   : > { %1909 = vmatpush3.xpose.msk.msra.mxu1 %vm760_vm2, %v929_v40  ;;  %1910 = vmatprep.mubr.msk.f32.mxu1 %vm2471_vm0, %v2472_v1 }
 0x400   : > { %1913 = vmatprep.subr.mxu1 %v2472_v1 }
 0x401   : > { %1972 = vmatpush3.bf16.msra.mxu0 %v1971_v36 }
 0x402   : > { %1911 = vmatmul.mubr.msk.f32.vlgmr.msra.gmra.mrb[6].mxu1 %vm760_vm2, %v927_v41 }
 0x403   : > { %1915 = vmatprep.mubr.msk.f32.mxu1 %vm2471_vm0, %v2472_v1 }
 0x4cb   : > { %v1172_v49 = vpop.f32.mrb[4].mxu0 }
 0x4cc   : > { %v1176_v50 = vmul.f32 0.35355338, %v1172_v49  ;;  %v1922_v51 = vpop.f32.mrb[5].mxu0 }
 0x4ce   : > { %v1179_v52 = vsel %vm839_vm3, -1e+09, %v1176_v50 }
 0x4cf   : > { %v1343_v53 = vpop.f32.mrb[6].mxu0  ;;  %v1180_v54 = vsel %vm760_vm2, %v1179_v52, -inf }
 0x4d0   : > { %1181 = vmax.xlane.f32.xlu0 %v1180_v54  ;;  %v1932_v55 = vpop.f32.mrb[7].mxu0  ;;  %v1347_v59 = vmul.f32 0.35355338, %v1343_v53 }
 0x4d1   : > { %v2960_v56 = vpop.f32.mrb[4].mxu1 }
 0x4d2   : > { %v1907_v57 = vpop.f32.mrb[5].mxu1  ;;  %v1350_v2 = vsel %vm839_vm3, -1e+09, %v1347_v59 }
 0x4d3   : > { %v1351_v3 = vsel %vm760_vm2, %v1350_v2, -inf }
 0x4d5   : > { %v1000_v58 = vpop.f32.mrb[6].mxu1 }
 0x4d6   : > { %v1004_v60 = vmul.f32 0.35355338, %v1000_v58  ;;  %v1912_v61 = vpop.f32.mrb[7].mxu1 }
 0x4d8   : > { %v1007_v62 = vsel %vm839_vm3, -1e+09, %v1004_v60 }
 0x4d9   : > { %v1008_v63 = vsel %vm760_vm2, %v1007_v62, -inf }
 0x4da   : > { %1009 = vmax.xlane.f32.xlu1 %v1008_v63 }
 0x4de   : > { %1352 = vmax.xlane.f32.xlu1 %v1351_v3 }
 0x55d   : > { %v1182_v4 = vpop.xlane.xlu0 %1181 }
 0x55e   : > { %v1183_v5 = vsub.f32 %v1179_v52, %v1182_v4 }
 0x560   : > { %v1184_v6 = vmul.f32 1.442695, %v1183_v5 }
 0x562   : > { %2096 = vpow2.f32 %v1184_v6 }
 0x567   : > { %v1010_v7 = vpop.xlane.xlu1 %1009 }
 0x568   : > { %v1011_v15 = vsub.f32 %v1007_v62, %v1010_v7 }
 0x56a   : > { %v1012_v16 = vmul.f32 1.442695, %v1011_v15 }
 0x56b   : > { %v1353_v8 = vpop.xlane.xlu1 %1352 }
 0x56c   : > { %v2097_v9 = vpop.eup %2096  ;;  %v1354_v10 = vsub.f32 %v1350_v2, %v1353_v8 }
 0x56d   : > { %v1186_v11 = vsel %vm760_vm2, %v2097_v9, 0.0 }
 0x56e   : > { %v1355_v12 = vmul.f32 1.442695, %v1354_v10  ;;  %1187 = vadd.xlane.f32.xlu0 %v1186_v11 }
 0x570   : > { %2098 = vpow2.f32 %v1355_v12 }
 0x571   : > { %2100 = vpow2.f32 %v1012_v16 }
 0x57a   : > { %v2099_v13 = vpop.eup %2098 }
 0x57b   : > { %v1357_v14 = vsel %vm760_vm2, %v2099_v13, 0.0  ;;  %v2101_v17 = vpop.eup %2100 }
 0x57c   : > { %1358 = vadd.xlane.f32.xlu1 %v1357_v14  ;;  %v1014_v18 = vsel %vm760_vm2, %v2101_v17, 0.0 }
 0x584   : > { %1022 = vrot.lane.b32.xlu0 %v2929_v38, %s2473_s15 }
 0x58d   : > { %1193 = vrot.lane.b32.xlu1 %v2929_v38, %s2474_s27 }
 0x5b1   : > { %1015 = vadd.xlane.f32.xlu1 %v1014_v18 }
 0x5c2   : > { %1364 = vrot.lane.b32.xlu1 %v2929_v38, %s2475_s28 }
 0x5fb   : > { %v1188_v19 = vpop.xlane.xlu0 %1187 }
 0x5fc   : > { %2102 = vrcp.f32 %v1188_v19 }
 0x5ff   : > { %v1023_v20 = vpop.permute.xlu0 %1022 }
 0x600   : > { %1914 = vmatpush3.msra.mxu1 %v1023_v20 }
 0x601   : > { %1923 = vmatprep.subr.mxu1 %v2472_v1 }
 0x606   : > { %v2103_v21 = vpop.eup %2102 }
 0x607   : > { %v1190_v22 = vmul.f32 %v2103_v21, %v2097_v9 }
 0x609   : > { %1814 = vst.msk [vmem:[%s2945_s20 + $0x10] sm:$0xff] %vm760_vm2, %v1190_v22  ;;  %v1359_v23 = vpop.xlane.xlu1 %1358 }
 0x60a   : > { %2104 = vrcp.f32 %v1359_v23 }
 0x60d   : > { %v1194_v26 = vpop.permute.xlu1 %1193 }
 0x614   : > { %v2105_v24 = vpop.eup %2104 }
 0x615   : > { %v1361_v25 = vmul.f32 %v2105_v24, %v2099_v13 }
 0x617   : > { %1818 = vst.msk [vmem:[%s2945_s20 + $0x18] sm:$0xff] %vm760_vm2, %v1361_v25 }
 0x63e   : > { %v1016_v27 = vpop.xlane.xlu1 %1015 }
 0x63f   : > { %2106 = vrcp.f32 %v1016_v27 }
 0x642   : > { %v1365_v30 = vpop.permute.xlu1 %1364 }
 0x649   : > { %v2107_v28 = vpop.eup %2106 }
 0x64a   : > { %v1018_v29 = vmul.f32 %v2107_v28, %v2101_v17 }
 0x64c   : > { %1810 = vst.msk [vmem:[%s2945_s20 + $0x8] sm:$0xff] %vm760_vm2, %v1018_v29  ;;  %1916 = vmatmul.mubr.msk.f32.vlgmr.msra.gmra.mrb[8].mxu1 %vm760_vm2, %v1018_v29 }
 0x64d   : > { %1924 = vmatpush3.msra.mxu1 %v1194_v26  ;;  %1925 = vmatprep.mubr.msk.f32.mxu1 %vm2471_vm0, %v2472_v1 }
 0x64e   : > { %1933 = vmatprep.subr.mxu1 %v2472_v1 }
 0x650   : > { %1926 = vmatmul.mubr.msk.f32.vlgmr.msra.gmra.mrb[10].mxu1 %vm760_vm2, %v1190_v22 }
 0x651   : > { %1934 = vmatpush3.msra.mxu1 %v1365_v30  ;;  %1935 = vmatprep.mubr.msk.f32.mxu1 %vm2471_vm0, %v2472_v1 }
 0x654   : > { %1936 = vmatmul.mubr.msk.f32.vlgmr.msra.gmra.mrb[12].mxu1 %vm760_vm2, %v1361_v25 }
 0x71f   : > { %v1094_v37 = vpop.f32.mrb[8].mxu1 }
 0x720   : > { %1441 = vrot.lane.b32.xlu0 %v1094_v37, %s2476_s26  ;;  %v1917_v38 = vpop.f32.mrb[9].mxu1 }
 0x723   : > { %v1265_v39 = vpop.f32.mrb[10].mxu1 }
 0x724   : > { %1445 = vrot.lane.b32.xlu1 %v1265_v39, %s2477_s30  ;;  %v1927_v1 = vpop.f32.mrb[11].mxu1 }
 0x727   : > { %v1436_v40 = vpop.f32.mrb[12].mxu1 }
 0x728   : > { %1449 = vrot.lane.b32.xlu0 %v1436_v40, %s2478_s18  ;;  %v1937_v0 = vpop.f32.mrb[13].mxu1 }
 0x792   : > { %v1442_v41 = vpop.permute.xlu0 %1441 }
 0x793   : > { %v1452_v43 = vsel %vm760_vm2, %v2960_v56, %v1442_v41 }
 0x796   : > { %v1446_v42 = vpop.permute.xlu1 %1445 }
 0x797   : > { %v1454_v44 = vsel %vm1453_vm4, %v1452_v43, %v1446_v42 }
 0x79a   : > { %v1450_v45 = vpop.permute.xlu0 %1449 }
 0x79b   : > { %v1456_v46 = vsel %vm1455_vm5, %v1454_v44, %v1450_v45 }
 0x79c   : > { %1947 = vmatmul.mubr.msk.f32.vlgmr.msra.gmra.mrb[8].mxu0 %vm532_vm1, %v1456_v46 }
 0x79d   : > { %2353 = shalt.err (!%p2350_p8)
}
 0x79e   : > { %s2354_s15 = scalar_lea.hbm %s3002_s17, 512  ;;  %s2358_s4 = scalar_lea.hbm %s3158_s1, 1024 }
 0x79f   : > { %p2355_p12 = scmp.ne.s32.totalorder %s3002_s17, %s2354_s15  ;;  %p2359_p4 = scmp.lt.u32.totalorder %s3002_s17, %s3158_s1 }
 0x7a0   : > { %p2360_p0 = scmp.lt.u32.totalorder %s2358_s4, %s2354_s15  ;;  %p2362_p7 = scmp.lt.u32.totalorder %s2354_s15, %s3002_s17 }
 0x7a1   : > { %p2356_p5 = pnand %p2355_p12, %p3159_p9 }
 0x7a2   : > { %p2361_p13 = por %p2360_p0, %p2359_p4 }
 0x7a3   : > { %p2357_p2 = pneg %p2356_p5 }
 0x7a4   : > { %p2363_p11 = por %p2362_p7, %p2361_p13 }
 0x7a6   : > { %p2364_p10 = pnand %p2363_p11, %p2357_p2 }
 0x7a8   : > { %2367 = shalt.err (!%p2364_p10)
}
 0x7a9   : > { %s2480_s18 = smov 128   ;;  %s1823_s22 = sshll.u32 %s2553_s13, 7 }
 0x7aa   : > { %1998 = dma.vmem_to_hbm [thread:$0]  (%p3159_p9), %s3004_s24, 512, %s3002_s17, %s1541_s19, %s2480_s18, %s2480_s18, %s2476_s26  }
 0x7ab   : > { %s517_s8 = scalar_lea.vmem [#allocation16], %s2851_s14  ;;  %s3160_s25 = sld [smem:[#allocation35_spill]] }
 0x7ac   : > { %s1554_s16 = sshll.u32 %s517_s8, 4  ;;  %s1536_s15 = scalar_lea.sflag [#allocation4], %s2848_s5  ;;  %s3038_s16 = int_to_ptr.vmem [resolvable:$true] %s1554_s16 }
 0x7ad   : > { %s2368_s27 = scalar_lea.vmem %s3038_s16, 128  ;;  %s2481_s13 = smov [#allocation16]  }
 0x7ae   : > { %p2369_p3 = scmp.ne.s32.totalorder %s3038_s16, %s2368_s27  ;;  %s2372_s14 = sshll.u32 %s2481_s13, 4  ;;  %s2373_s14 = int_to_ptr.vmem [resolvable:$false] %s2372_s14 }
 0x7af   : > { %s2374_s26 = scalar_lea.vmem %s2373_s14, 256  ;;  %p2375_p8 = scmp.lt.s32.totalorder %s3038_s16, %s2373_s14 }
 0x7b0   : > { %p2370_p6 = pnand %p2369_p3, %p3159_p9  ;;  %p2376_p12 = scmp.lt.s32.totalorder %s2374_s26, %s2368_s27 }
 0x7b1   : > { %s3036_s9 = scalar_lea.hbm %s3160_s25, %s1823_s22 }
 0x7b2   : > { %p2371_p1 = pneg %p2370_p6  ;;  %p2377_p5 = por %p2376_p12, %p2375_p8 }
 0x7b4   : > { %p2378_p2 = pnand %p2377_p5, %p2371_p1 }
 0x86f   : > { %v1530_v47 = vpop.f32.mrb[8].mxu0 }
 0x870   : > { %1534 = vst.msk [vmem:[%s517_s8] sm:$0xff] %vm532_vm1, %v1530_v47  ;;  %v1948_v48 = vpop.f32.mrb[9].mxu0 }
 0x871   : > { %2381 = shalt.err (!%p2378_p2)
}
 0x872   : > { %s2382_s5 = scalar_lea.hbm %s3036_s9, 128  ;;  %s2386_s19 = scalar_lea.hbm %s3160_s25, 256 }
 0x873   : > { %p2383_p4 = scmp.ne.s32.totalorder %s3036_s9, %s2382_s5  ;;  %p2387_p7 = scmp.lt.u32.totalorder %s3036_s9, %s3160_s25 }
 0x874   : > { %p2388_p11 = scmp.lt.u32.totalorder %s2386_s19, %s2382_s5  ;;  %p2390_p3 = scmp.lt.u32.totalorder %s2382_s5, %s3036_s9 }
 0x875   : > { %p2384_p0 = pnand %p2383_p4, %p3159_p9 }
 0x876   : > { %p2389_p10 = por %p2388_p11, %p2387_p7 }
 0x877   : > { %p2385_p13 = pneg %p2384_p0 }
 0x878   : > { %p2391_p6 = por %p2390_p3, %p2389_p10 }
 0x87a   : > { %p2392_p1 = pnand %p2391_p6, %p2385_p13 }
 0x87c   : > { %2395 = shalt.err (!%p2392_p1)
}
 0x87d   : > { %1997 = dma.vmem_to_hbm [thread:$0]  (%p3159_p9), %s3038_s16, 128, %s3036_s9, %s1536_s15  }
 0x87e PF: > { %s3161_s20 = sld [smem:[#allocation27_spill]]  ;;  %s3162_s30 = sld [smem:[#allocation28_spill]] }
 0x87f   : > { %p3164_p12 = scmp.ge.s32.totalorder %s2458_s12, 2 }
 0x884   : > { %s1582_s18 = sand.u32 1, %s3161_s20   ;;  %p3163_p8 = scmp.ne.s32.totalorder %s3162_s30, 0 }
 0x885   : > { %s1583_s22 = scalar_lea.sflag [#allocation4], %s1582_s18 }
 0x886   : > { %p2028_p5 = pnand %p3164_p12, %p3163_p8 }
 0x888   : > { %2437 = dma.done.wait (!%p2028_p5), %s1583_s22, 128  }
 0x889   : > { %2439 = vsyncadd (!%p2028_p5), %s1583_s22, 4294967168  ;;  %s1592_s8 = scalar_lea.sflag [#allocation18], %s1582_s18 }
 0x88a   : > { %2441 = dma.done.wait (!%p2028_p5), %s1592_s8, 512  }
 0x88b   : > { %2443 = vsyncadd (!%p2028_p5), %s1592_s8, 4294966784  ;;  %s3165_s12 = sld [smem:[#allocation29_spill]]  ;;  %s3166_s23 = sld [smem:[#allocation31_spill]] }
 0x88c   : > { %s3167_s30 = smov %s2450_s10  ;;  %s3168_s10 = smov %s2454_s11 }
 0x891   : > { %p34_p9 = scmp.ge.s32.totalorder %s3165_s12, 4   ;;  %s3169_s11 = smov %s3166_s23 }
 0x893   :  { %36 = sbr.rel (!%p34_p9) target bundleno = 19 (0x13), region = 170 }
 0x89a   :  { %1597 = vsyncpa [#allocation3], 1 }
 0x89b   :  { %1599 = vsyncpa [#allocation3 + $0x1], 1 }
 0x89c   :  { %1600 = vsyncpa [#allocation6], 1 }
 0x89d   :  { %1602 = vsyncpa [#allocation6 + $0x1], 1 }
 0x89e   :  { %1603 = vsyncpa [#allocation9], 1 }
 0x89f   :  { %1605 = vsyncpa [#allocation9 + $0x1], 1 }
 0x8a0   :  { %1606 = vsyncpa [#allocation12], 1 }
 0x8a1   :  { %1607 = vsyncpa [#allocation15], 1 }
 0x8a2   :  { %1608 = vsyncpa [#allocation4], 1 }
 0x8a3   :  { %1610 = vsyncpa [#allocation4 + $0x1], 1 }
 0x8a4   :  { %1611 = vsyncpa [#allocation18], 1 }
 0x8a5   :  { %1613 = vsyncpa [#allocation18 + $0x1], 1 }

</bundles_post_ra>
